<compile_context>
chip_gen: v7x
topology: tpu7x:2x2x1
jax: 0.10.0
libtpu: 0.0.40
codegen_flags: <defaults>
</compile_context>

<pallas_src>
import functools

import jax
import jax.numpy as jnp
from jax import lax
from jax.experimental import pallas as pl
from jax.experimental.pallas import tpu as pltpu

_LANES = 128
_MAX_TILE_ROWS = 1024  # (1024,128) f32 = 512 KiB per input tile


def _causal_loss_kernel(p_zero_ref, mu_ref, sigma_ref, treat_ref,
                        out_pred_ref, out_tgt_ref, dsl_ref,
                        den_ref, outc_ref, dsl_out_ref,
                        *, batch: int, tile_rows: int, need_mask: bool):
    f32 = jnp.float32
    eps = 1e-8

    p_zero = p_zero_ref[...].astype(f32)   # predictions['p_zero'].squeeze()
    mu = mu_ref[...].astype(f32)
    sigma = sigma_ref[...].astype(f32)
    t_l = treat_ref[...].astype(f32)       # targets['treatment_L']
    y_pred = out_pred_ref[...].astype(f32) # predictions['outcome'].squeeze()
    y_tgt = out_tgt_ref[...].astype(f32)   # targets['outcome']
    dsl = dsl_ref[...].astype(f32)

    row0 = lax.broadcasted_iota(jnp.int32, (8, _LANES), 0) == 0

    def emit(valid):
        if valid is None:
            p_z, sig, y_p, y_t, t, d = p_zero, sigma, y_pred, y_tgt, t_l, dsl
        else:
            # Sanitize padded / out-of-range lanes BEFORE any log / divide.
            p_z = jnp.where(valid, p_zero, 0.5)
            sig = jnp.where(valid, sigma, 1.0)
            y_p = jnp.where(valid, y_pred, 0.5)
            y_t = jnp.where(valid, y_tgt, 0.0)
            t = jnp.where(valid, t_l, 0.0)
            d = jnp.where(valid, dsl, 0.0)

        # ---------------- ZILN density loss (per element) ----------------
        is_zero = (t == 0.0)
        # density is shared between the ZILN log term and the IPW weight:
        #   zero lanes use log(1-p_zero+eps), positive lanes log(p_zero+eps).
        density = jnp.where(is_zero, 1.0 - p_z, p_z)
        log_density = jnp.log(density + eps)
        log_l = jnp.log(t + eps)                      # computed once, reused
        # NOTE: sigma division has no eps, matching the torch reference.
        z = (log_l - mu) / sig
        normal_pdf = -0.5 * z * z - jnp.log(sig + eps)
        den_e = -log_density - jnp.where(is_zero, 0.0, normal_pdf - log_l)

        # ---------------- IPW weights (no-grad branch in torch) -----------
        # Exact divide (not approx reciprocal) for parity with the reference.
        ipw = jnp.clip(1.0 / (density + 1e-8), 0.1, 10.0)

        # ---------------- outcome BCE (nn.BCELoss clamps logs at -100) ----
        # Both logs kept so soft (non-binary) targets stay exact.
        log_p = jnp.maximum(jnp.log(y_p), -100.0)
        log_1mp = jnp.maximum(jnp.log(1.0 - y_p), -100.0)
        bce = -(y_t * log_p + (1.0 - y_t) * log_1mp)
        out_e = ipw * bce

        dsl_e = d

        if valid is not None:
            den_e = jnp.where(valid, den_e, 0.0)
            out_e = jnp.where(valid, out_e, 0.0)
            # dsl_e already zeroed on invalid lanes.

        def fold(x):
            # (tile_rows,128) -> column sums in row 0 of an (8,128) slab.
            s = jnp.sum(x, axis=0, keepdims=True)          # (1,128) XLU reduce
            return jnp.where(row0, s, 0.0)                 # (8,128), dense vst

        den_ref[...] = fold(den_e).reshape(1, 8, _LANES)
        outc_ref[...] = fold(out_e).reshape(1, 8, _LANES)
        dsl_out_ref[...] = fold(dsl_e).reshape(1, 8, _LANES)

    if need_mask:
        pid = pl.program_id(0)
        last = pl.num_programs(0) - 1

        @pl.when(pid != last)            # full tiles: no mask / iota work
        def _():
            emit(None)

        @pl.when(pid == last)            # only the last tile can be ragged
        def _():
            ridx = lax.broadcasted_iota(jnp.int32, (tile_rows, _LANES), 0)
            lidx = lax.broadcasted_iota(jnp.int32, (tile_rows, _LANES), 1)
            flat = pid * (tile_rows * _LANES) + ridx * _LANES + lidx
            emit(flat < batch)
    else:
        emit(None)


def causal_loss(predictions, targets, dsl_scores, *, beta=1.0, lambda_dsl=0.1):
    """JAX/Pallas equivalent of CausalLoss.forward.

    predictions: dict with 'p_zero' [B,1], 'mu' [B], 'sigma' [B], 'outcome' [B,1]
    targets:     dict with 'treatment_L' [B], 'outcome' [B]
    dsl_scores:  [B]
    Returns dict of scalar losses {'total','density','outcome','dsl'}.
    """
    f32 = jnp.float32
    b = int(predictions['mu'].shape[0])

    raw_inputs = (predictions['p_zero'], predictions['mu'], predictions['sigma'],
                  targets['treatment_L'], predictions['outcome'],
                  targets['outcome'], dsl_scores)

    # Sublane-packing granule of the narrowest input dtype (f32:8, bf16:16, 8-bit:32).
    min_bytes = min(jnp.dtype(x.dtype).itemsize for x in raw_inputs)
    align = {4: 8, 2: 16, 1: 32}.get(min_bytes, 8)

    rows = -(-b // _LANES)                 # lanes: pad B to next multiple of 128
    rows = -(-rows // align) * align       # sublane packing alignment only
    tile_rows = min(rows, _MAX_TILE_ROWS)
    num_tiles = -(-rows // tile_rows)      # last tile may be ragged
    padded = rows * _LANES
    need_mask = (padded != b) or (rows % tile_rows != 0)

    def slab(x):
        # Keep native dtype (bf16 stays bf16 -> half the DMA bytes); the kernel
        # upcasts per-tile.  Only pad when B is not lane-aligned.
        x = jnp.reshape(x, (-1,))          # also squeezes [B,1] -> [B]
        if x.dtype == jnp.bool_:
            x = x.astype(f32)
        if padded != b:
            x = jnp.pad(x, (0, padded - b))
        return jnp.reshape(x, (rows, _LANES))

    inputs = tuple(slab(x) for x in raw_inputs)

    tile_spec = pl.BlockSpec((tile_rows, _LANES), lambda i: (i, 0))
    part_spec = pl.BlockSpec((1, 8, _LANES), lambda i: (i, 0, 0))
    part_shape = jax.ShapeDtypeStruct((num_tiles, 8, _LANES), f32)

    kernel = functools.partial(_causal_loss_kernel,
                               batch=b, tile_rows=tile_rows,
                               need_mask=need_mask)

    den_p, out_p, dsl_p = pl.pallas_call(
        kernel,
        out_shape=(part_shape, part_shape, part_shape),
        grid_spec=pltpu.PrefetchScalarGridSpec(
            num_scalar_prefetch=0,
            grid=(num_tiles,),
            in_specs=[tile_spec] * len(inputs),
            out_specs=(part_spec, part_spec, part_spec),
        ),
        compiler_params=pltpu.CompilerParams(
            dimension_semantics=("parallel",)),   # both TCs on v7x
    )(*inputs)

    # Tiny final reduction (num_tiles*8*128 f32 per loss) done in JAX, as
    # recommended: it keeps the grid parallel and removes resident accumulators.
    inv_b = 1.0 / float(b)
    l_den = jnp.sum(den_p) * inv_b
    l_out = jnp.sum(out_p) * inv_b
    l_dsl = jnp.sum(dsl_p) * inv_b
    total = l_den + beta * l_out + lambda_dsl * l_dsl
    return {'total': total, 'density': l_den, 'outcome': l_out, 'dsl': l_dsl}


def _reference(predictions, targets, dsl_scores, *, beta, lambda_dsl):
    """Pure-JAX transcription of the torch module (for verification)."""
    eps = 1e-8
    f32 = jnp.float32
    p = jnp.reshape(predictions['p_zero'], (-1,)).astype(f32)
    mu = predictions['mu'].astype(f32)
    sigma = predictions['sigma'].astype(f32)
    t = targets['treatment_L'].astype(f32)
    yp = jnp.reshape(predictions['outcome'], (-1,)).astype(f32)
    yt = targets['outcome'].astype(f32)

    is_zero = (t == 0).astype(f32)
    is_pos = 1.0 - is_zero
    loss_zero = -is_zero * jnp.log(1.0 - p + eps)
    log_l = jnp.log(t + eps)
    normal_pdf = -0.5 * ((log_l - mu) / sigma) ** 2 - jnp.log(sigma + eps)
    loss_pos = -is_pos * (jnp.log(p + eps) + normal_pdf - log_l)
    l_den = jnp.mean(loss_zero + loss_pos)

    density = is_zero * (1.0 - p) + is_pos * p
    ipw = jnp.clip(1.0 / (density + 1e-8), 0.1, 10.0)
    log_p = jnp.maximum(jnp.log(yp), -100.0)
    log_1mp = jnp.maximum(jnp.log(1.0 - yp), -100.0)
    bce = -(yt * log_p + (1.0 - yt) * log_1mp)
    l_out = jnp.mean(ipw * bce)

    l_dsl = jnp.mean(dsl_scores.astype(f32))
    total = l_den + beta * l_out + lambda_dsl * l_dsl
    return {'total': total, 'density': l_den, 'outcome': l_out, 'dsl': l_dsl}


if __name__ == "__main__":
    import numpy as np

    B = 8
    key = jax.random.PRNGKey(0)
    ks = jax.random.split(key, 8)

    p_zero = jax.random.uniform(ks[0], (B, 1), minval=0.05, maxval=0.95)
    mu = jax.random.normal(ks[1], (B,))
    sigma = jax.random.uniform(ks[2], (B,), minval=0.5, maxval=1.5)
    outcome_pred = jax.random.uniform(ks[3], (B, 1), minval=0.05, maxval=0.95)

    treatment_raw = jax.random.uniform(ks[4], (B,), minval=0.1, maxval=5.0)
    zero_mask = jax.random.bernoulli(ks[5], 0.4, (B,))
    treatment_L = jnp.where(zero_mask, 0.0, treatment_raw)

    outcome_tgt = jax.random.bernoulli(ks[6], 0.5, (B,)).astype(jnp.float32)
    dsl_scores = jax.random.normal(ks[7], (B,))

    predictions = {'p_zero': p_zero, 'mu': mu, 'sigma': sigma,
                   'outcome': outcome_pred}
    targets = {'treatment_L': treatment_L, 'outcome': outcome_tgt}

    losses = causal_loss(predictions, targets, dsl_scores,
                         beta=1.0, lambda_dsl=0.1)
    losses = jax.block_until_ready(losses)

    ref = _reference(predictions, targets, dsl_scores, beta=1.0, lambda_dsl=0.1)
    for k in ('total', 'density', 'outcome', 'dsl'):
        np.testing.assert_allclose(np.asarray(losses[k]), np.asarray(ref[k]),
                                   rtol=1e-3, atol=1e-3)

    print("KERNEL_OK")
</pallas_src>

<mosaic_0001>
module attributes {stable_mosaic.version = 11 : i64} {
  func.func @_causal_loss_kernel(%arg0: i32, %arg1: memref<8x128xf32, #tpu.memory_space<vmem>>, %arg2: memref<8x128xf32, #tpu.memory_space<vmem>>, %arg3: memref<8x128xf32, #tpu.memory_space<vmem>>, %arg4: memref<8x128xf32, #tpu.memory_space<vmem>>, %arg5: memref<8x128xf32, #tpu.memory_space<vmem>>, %arg6: memref<8x128xf32, #tpu.memory_space<vmem>>, %arg7: memref<8x128xf32, #tpu.memory_space<vmem>>, %arg8: memref<1x8x128xf32, #tpu.memory_space<vmem>>, %arg9: memref<1x8x128xf32, #tpu.memory_space<vmem>>, %arg10: memref<1x8x128xf32, #tpu.memory_space<vmem>>) attributes {dimension_semantics = [#tpu.dimension_semantics<parallel>], iteration_bounds = array<i64: 1>, scalar_prefetch = 0 : i64, scratch_operands = 0 : i64, tpu.core_type = #tpu.core_type<tc>, window_params = [{transform_indices = @transform_0, window_bounds = array<i64: 8, 128>}, {transform_indices = @transform_1, window_bounds = array<i64: 8, 128>}, {transform_indices = @transform_2, window_bounds = array<i64: 8, 128>}, {transform_indices = @transform_3, window_bounds = array<i64: 8, 128>}, {transform_indices = @transform_4, window_bounds = array<i64: 8, 128>}, {transform_indices = @transform_5, window_bounds = array<i64: 8, 128>}, {transform_indices = @transform_6, window_bounds = array<i64: 8, 128>}, {transform_indices = @transform_7, window_bounds = array<i64: 1, 8, 128>}, {transform_indices = @transform_8, window_bounds = array<i64: 1, 8, 128>}, {transform_indices = @transform_9, window_bounds = array<i64: 1, 8, 128>}]} {
    %c0 = arith.constant 0 : index
    %c0_0 = arith.constant 0 : index
    %0 = vector.load %arg1[%c0, %c0_0] : memref<8x128xf32, #tpu.memory_space<vmem>>, vector<8x128xf32>
    %c0_1 = arith.constant 0 : index
    %c0_2 = arith.constant 0 : index
    %1 = vector.load %arg2[%c0_1, %c0_2] : memref<8x128xf32, #tpu.memory_space<vmem>>, vector<8x128xf32>
    %c0_3 = arith.constant 0 : index
    %c0_4 = arith.constant 0 : index
    %2 = vector.load %arg3[%c0_3, %c0_4] : memref<8x128xf32, #tpu.memory_space<vmem>>, vector<8x128xf32>
    %c0_5 = arith.constant 0 : index
    %c0_6 = arith.constant 0 : index
    %3 = vector.load %arg4[%c0_5, %c0_6] : memref<8x128xf32, #tpu.memory_space<vmem>>, vector<8x128xf32>
    %c0_7 = arith.constant 0 : index
    %c0_8 = arith.constant 0 : index
    %4 = vector.load %arg5[%c0_7, %c0_8] : memref<8x128xf32, #tpu.memory_space<vmem>>, vector<8x128xf32>
    %c0_9 = arith.constant 0 : index
    %c0_10 = arith.constant 0 : index
    %5 = vector.load %arg6[%c0_9, %c0_10] : memref<8x128xf32, #tpu.memory_space<vmem>>, vector<8x128xf32>
    %c0_11 = arith.constant 0 : index
    %c0_12 = arith.constant 0 : index
    %6 = vector.load %arg7[%c0_11, %c0_12] : memref<8x128xf32, #tpu.memory_space<vmem>>, vector<8x128xf32>
    %7 = tpu.iota {dimensions = array<i32: 0>} : vector<8x128xi32>
    %c0_i32 = arith.constant 0 : i32
    %8 = vector.broadcast %c0_i32 : i32 to vector<8x128xi32>
    %9 = arith.cmpi eq, %7, %8 : vector<8x128xi32>
    %c0_i32_13 = arith.constant 0 : i32
    %10 = arith.cmpi ne, %arg0, %c0_i32_13 : i32
    %11 = arith.extui %10 : i1 to i32
    %c0_i32_14 = arith.constant 0 : i32
    %12 = arith.cmpi ne, %11, %c0_i32_14 : i32
    scf.if %12 {
      %cst = arith.constant 0.000000e+00 : f32
      %16 = vector.broadcast %cst : f32 to vector<8x128xf32>
      %17 = arith.cmpf oeq, %3, %16 : vector<8x128xf32>
      %cst_17 = arith.constant 1.000000e+00 : f32
      %18 = vector.broadcast %cst_17 : f32 to vector<8x128xf32>
      %19 = arith.subf %18, %0 : vector<8x128xf32>
      %20 = arith.select %17, %19, %0 : vector<8x128xi1>, vector<8x128xf32>
      %cst_18 = arith.constant 9.99999993E-9 : f32
      %21 = vector.broadcast %cst_18 : f32 to vector<8x128xf32>
      %22 = arith.addf %20, %21 : vector<8x128xf32>
      %23 = math.log %22 : vector<8x128xf32>
      %cst_19 = arith.constant 9.99999993E-9 : f32
      %24 = vector.broadcast %cst_19 : f32 to vector<8x128xf32>
      %25 = arith.addf %3, %24 : vector<8x128xf32>
      %26 = math.log %25 : vector<8x128xf32>
      %27 = arith.subf %26, %1 : vector<8x128xf32>
      %28 = arith.divf %27, %2 : vector<8x128xf32>
      %cst_20 = arith.constant -5.000000e-01 : f32
      %29 = vector.broadcast %cst_20 : f32 to vector<8x128xf32>
      %30 = arith.mulf %29, %28 : vector<8x128xf32>
      %31 = arith.mulf %30, %28 : vector<8x128xf32>
      %cst_21 = arith.constant 9.99999993E-9 : f32
      %32 = vector.broadcast %cst_21 : f32 to vector<8x128xf32>
      %33 = arith.addf %2, %32 : vector<8x128xf32>
      %34 = math.log %33 : vector<8x128xf32>
      %35 = arith.subf %31, %34 : vector<8x128xf32>
      %cst_22 = arith.constant 0.000000e+00 : f32
      %36 = vector.broadcast %cst_22 : f32 to vector<8x128xf32>
      %37 = arith.subf %36, %23 : vector<8x128xf32>
      %38 = arith.subf %35, %26 : vector<8x128xf32>
      %cst_23 = arith.constant 0.000000e+00 : f32
      %39 = vector.broadcast %cst_23 : f32 to vector<8x128xf32>
      %40 = arith.select %17, %39, %38 : vector<8x128xi1>, vector<8x128xf32>
      %41 = arith.subf %37, %40 : vector<8x128xf32>
      %cst_24 = arith.constant 9.99999993E-9 : f32
      %42 = vector.broadcast %cst_24 : f32 to vector<8x128xf32>
      %43 = arith.addf %20, %42 : vector<8x128xf32>
      %cst_25 = arith.constant 1.000000e+00 : f32
      %44 = vector.broadcast %cst_25 : f32 to vector<8x128xf32>
      %45 = arith.divf %44, %43 : vector<8x128xf32>
      %cst_26 = arith.constant 1.000000e-01 : f32
      %cst_27 = arith.constant 1.000000e+01 : f32
      %46 = vector.broadcast %cst_26 : f32 to vector<8x128xf32>
      %47 = arith.maximumf %46, %45 : vector<8x128xf32>
      %48 = vector.broadcast %cst_27 : f32 to vector<8x128xf32>
      %49 = arith.minimumf %48, %47 : vector<8x128xf32>
      %50 = math.log %4 : vector<8x128xf32>
      %cst_28 = arith.constant -1.000000e+02 : f32
      %51 = vector.broadcast %cst_28 : f32 to vector<8x128xf32>
      %52 = arith.maximumf %50, %51 : vector<8x128xf32>
      %cst_29 = arith.constant 1.000000e+00 : f32
      %53 = vector.broadcast %cst_29 : f32 to vector<8x128xf32>
      %54 = arith.subf %53, %4 : vector<8x128xf32>
      %55 = math.log %54 : vector<8x128xf32>
      %cst_30 = arith.constant -1.000000e+02 : f32
      %56 = vector.broadcast %cst_30 : f32 to vector<8x128xf32>
      %57 = arith.maximumf %55, %56 : vector<8x128xf32>
      %58 = arith.mulf %5, %52 : vector<8x128xf32>
      %cst_31 = arith.constant 1.000000e+00 : f32
      %59 = vector.broadcast %cst_31 : f32 to vector<8x128xf32>
      %60 = arith.subf %59, %5 : vector<8x128xf32>
      %61 = arith.mulf %60, %57 : vector<8x128xf32>
      %62 = arith.addf %58, %61 : vector<8x128xf32>
      %cst_32 = arith.constant 0.000000e+00 : f32
      %63 = vector.broadcast %cst_32 : f32 to vector<8x128xf32>
      %64 = arith.subf %63, %62 : vector<8x128xf32>
      %65 = arith.mulf %49, %64 : vector<8x128xf32>
      %cst_33 = arith.constant dense<0.000000e+00> : vector<128xf32>
      %66 = vector.multi_reduction <add>, %41, %cst_33 [0] : vector<8x128xf32> to vector<128xf32>
      %67 = vector.shape_cast %66 : vector<128xf32> to vector<1x128xf32>
      %cst_34 = arith.constant 0.000000e+00 : f32
      %68 = vector.shape_cast %67 : vector<1x128xf32> to vector<1x128xf32>
      %69 = vector.broadcast %68 : vector<1x128xf32> to vector<8x128xf32>
      %70 = vector.broadcast %cst_34 : f32 to vector<8x128xf32>
      %71 = arith.select %9, %69, %70 : vector<8x128xi1>, vector<8x128xf32>
      %72 = vector.shape_cast %71 : vector<8x128xf32> to vector<1x8x128xf32>
      %c0_35 = arith.constant 0 : index
      %c0_36 = arith.constant 0 : index
      %c0_37 = arith.constant 0 : index
      %73 = vector.load %arg8[%c0_35, %c0_36, %c0_37] : memref<1x8x128xf32, #tpu.memory_space<vmem>>, vector<1x8x128xf32>
      tpu.vector_store %arg8[%c0_35, %c0_36, %c0_37], %72 {strides = array<i32>} : memref<1x8x128xf32, #tpu.memory_space<vmem>>, vector<1x8x128xf32>,
      %cst_38 = arith.constant dense<0.000000e+00> : vector<128xf32>
      %74 = vector.multi_reduction <add>, %65, %cst_38 [0] : vector<8x128xf32> to vector<128xf32>
      %75 = vector.shape_cast %74 : vector<128xf32> to vector<1x128xf32>
      %cst_39 = arith.constant 0.000000e+00 : f32
      %76 = vector.shape_cast %75 : vector<1x128xf32> to vector<1x128xf32>
      %77 = vector.broadcast %76 : vector<1x128xf32> to vector<8x128xf32>
      %78 = vector.broadcast %cst_39 : f32 to vector<8x128xf32>
      %79 = arith.select %9, %77, %78 : vector<8x128xi1>, vector<8x128xf32>
      %80 = vector.shape_cast %79 : vector<8x128xf32> to vector<1x8x128xf32>
      %c0_40 = arith.constant 0 : index
      %c0_41 = arith.constant 0 : index
      %c0_42 = arith.constant 0 : index
      %81 = vector.load %arg9[%c0_40, %c0_41, %c0_42] : memref<1x8x128xf32, #tpu.memory_space<vmem>>, vector<1x8x128xf32>
      tpu.vector_store %arg9[%c0_40, %c0_41, %c0_42], %80 {strides = array<i32>} : memref<1x8x128xf32, #tpu.memory_space<vmem>>, vector<1x8x128xf32>,
      %cst_43 = arith.constant dense<0.000000e+00> : vector<128xf32>
      %82 = vector.multi_reduction <add>, %6, %cst_43 [0] : vector<8x128xf32> to vector<128xf32>
      %83 = vector.shape_cast %82 : vector<128xf32> to vector<1x128xf32>
      %cst_44 = arith.constant 0.000000e+00 : f32
      %84 = vector.shape_cast %83 : vector<1x128xf32> to vector<1x128xf32>
      %85 = vector.broadcast %84 : vector<1x128xf32> to vector<8x128xf32>
      %86 = vector.broadcast %cst_44 : f32 to vector<8x128xf32>
      %87 = arith.select %9, %85, %86 : vector<8x128xi1>, vector<8x128xf32>
      %88 = vector.shape_cast %87 : vector<8x128xf32> to vector<1x8x128xf32>
      %c0_45 = arith.constant 0 : index
      %c0_46 = arith.constant 0 : index
      %c0_47 = arith.constant 0 : index
      %89 = vector.load %arg10[%c0_45, %c0_46, %c0_47] : memref<1x8x128xf32, #tpu.memory_space<vmem>>, vector<1x8x128xf32>
      tpu.vector_store %arg10[%c0_45, %c0_46, %c0_47], %88 {strides = array<i32>} : memref<1x8x128xf32, #tpu.memory_space<vmem>>, vector<1x8x128xf32>,
    } else {
    }
    %c0_i32_15 = arith.constant 0 : i32
    %13 = arith.cmpi eq, %arg0, %c0_i32_15 : i32
    %14 = arith.extui %13 : i1 to i32
    %c0_i32_16 = arith.constant 0 : i32
    %15 = arith.cmpi ne, %14, %c0_i32_16 : i32
    scf.if %15 {
      %16 = tpu.iota {dimensions = array<i32: 0>} : vector<8x128xi32>
      %17 = tpu.iota {dimensions = array<i32: 1>} : vector<8x128xi32>
      %c1024_i32 = arith.constant 1024 : i32
      %18 = arith.muli %arg0, %c1024_i32 : i32
      %c128_i32 = arith.constant 128 : i32
      %19 = vector.broadcast %c128_i32 : i32 to vector<8x128xi32>
      %20 = arith.muli %16, %19 : vector<8x128xi32>
      %21 = vector.broadcast %18 : i32 to vector<8x128xi32>
      %22 = arith.addi %21, %20 : vector<8x128xi32>
      %23 = arith.addi %22, %17 : vector<8x128xi32>
      %c8_i32 = arith.constant 8 : i32
      %24 = vector.broadcast %c8_i32 : i32 to vector<8x128xi32>
      %25 = arith.cmpi slt, %23, %24 : vector<8x128xi32>
      %cst = arith.constant 5.000000e-01 : f32
      %26 = vector.broadcast %cst : f32 to vector<8x128xf32>
      %27 = arith.select %25, %0, %26 : vector<8x128xi1>, vector<8x128xf32>
      %cst_17 = arith.constant 1.000000e+00 : f32
      %28 = vector.broadcast %cst_17 : f32 to vector<8x128xf32>
      %29 = arith.select %25, %2, %28 : vector<8x128xi1>, vector<8x128xf32>
      %cst_18 = arith.constant 5.000000e-01 : f32
      %30 = vector.broadcast %cst_18 : f32 to vector<8x128xf32>
      %31 = arith.select %25, %4, %30 : vector<8x128xi1>, vector<8x128xf32>
      %cst_19 = arith.constant 0.000000e+00 : f32
      %32 = vector.broadcast %cst_19 : f32 to vector<8x128xf32>
      %33 = arith.select %25, %5, %32 : vector<8x128xi1>, vector<8x128xf32>
      %cst_20 = arith.constant 0.000000e+00 : f32
      %34 = vector.broadcast %cst_20 : f32 to vector<8x128xf32>
      %35 = arith.select %25, %3, %34 : vector<8x128xi1>, vector<8x128xf32>
      %cst_21 = arith.constant 0.000000e+00 : f32
      %36 = vector.broadcast %cst_21 : f32 to vector<8x128xf32>
      %37 = arith.select %25, %6, %36 : vector<8x128xi1>, vector<8x128xf32>
      %cst_22 = arith.constant 0.000000e+00 : f32
      %38 = vector.broadcast %cst_22 : f32 to vector<8x128xf32>
      %39 = arith.cmpf oeq, %35, %38 : vector<8x128xf32>
      %cst_23 = arith.constant 1.000000e+00 : f32
      %40 = vector.broadcast %cst_23 : f32 to vector<8x128xf32>
      %41 = arith.subf %40, %27 : vector<8x128xf32>
      %42 = arith.select %39, %41, %27 : vector<8x128xi1>, vector<8x128xf32>
      %cst_24 = arith.constant 9.99999993E-9 : f32
      %43 = vector.broadcast %cst_24 : f32 to vector<8x128xf32>
      %44 = arith.addf %42, %43 : vector<8x128xf32>
      %45 = math.log %44 : vector<8x128xf32>
      %cst_25 = arith.constant 9.99999993E-9 : f32
      %46 = vector.broadcast %cst_25 : f32 to vector<8x128xf32>
      %47 = arith.addf %35, %46 : vector<8x128xf32>
      %48 = math.log %47 : vector<8x128xf32>
      %49 = arith.subf %48, %1 : vector<8x128xf32>
      %50 = arith.divf %49, %29 : vector<8x128xf32>
      %cst_26 = arith.constant -5.000000e-01 : f32
      %51 = vector.broadcast %cst_26 : f32 to vector<8x128xf32>
      %52 = arith.mulf %51, %50 : vector<8x128xf32>
      %53 = arith.mulf %52, %50 : vector<8x128xf32>
      %cst_27 = arith.constant 9.99999993E-9 : f32
      %54 = vector.broadcast %cst_27 : f32 to vector<8x128xf32>
      %55 = arith.addf %29, %54 : vector<8x128xf32>
      %56 = math.log %55 : vector<8x128xf32>
      %57 = arith.subf %53, %56 : vector<8x128xf32>
      %cst_28 = arith.constant 0.000000e+00 : f32
      %58 = vector.broadcast %cst_28 : f32 to vector<8x128xf32>
      %59 = arith.subf %58, %45 : vector<8x128xf32>
      %60 = arith.subf %57, %48 : vector<8x128xf32>
      %cst_29 = arith.constant 0.000000e+00 : f32
      %61 = vector.broadcast %cst_29 : f32 to vector<8x128xf32>
      %62 = arith.select %39, %61, %60 : vector<8x128xi1>, vector<8x128xf32>
      %63 = arith.subf %59, %62 : vector<8x128xf32>
      %cst_30 = arith.constant 9.99999993E-9 : f32
      %64 = vector.broadcast %cst_30 : f32 to vector<8x128xf32>
      %65 = arith.addf %42, %64 : vector<8x128xf32>
      %cst_31 = arith.constant 1.000000e+00 : f32
      %66 = vector.broadcast %cst_31 : f32 to vector<8x128xf32>
      %67 = arith.divf %66, %65 : vector<8x128xf32>
      %cst_32 = arith.constant 1.000000e-01 : f32
      %cst_33 = arith.constant 1.000000e+01 : f32
      %68 = vector.broadcast %cst_32 : f32 to vector<8x128xf32>
      %69 = arith.maximumf %68, %67 : vector<8x128xf32>
      %70 = vector.broadcast %cst_33 : f32 to vector<8x128xf32>
      %71 = arith.minimumf %70, %69 : vector<8x128xf32>
      %72 = math.log %31 : vector<8x128xf32>
      %cst_34 = arith.constant -1.000000e+02 : f32
      %73 = vector.broadcast %cst_34 : f32 to vector<8x128xf32>
      %74 = arith.maximumf %72, %73 : vector<8x128xf32>
      %cst_35 = arith.constant 1.000000e+00 : f32
      %75 = vector.broadcast %cst_35 : f32 to vector<8x128xf32>
      %76 = arith.subf %75, %31 : vector<8x128xf32>
      %77 = math.log %76 : vector<8x128xf32>
      %cst_36 = arith.constant -1.000000e+02 : f32
      %78 = vector.broadcast %cst_36 : f32 to vector<8x128xf32>
      %79 = arith.maximumf %77, %78 : vector<8x128xf32>
      %80 = arith.mulf %33, %74 : vector<8x128xf32>
      %cst_37 = arith.constant 1.000000e+00 : f32
      %81 = vector.broadcast %cst_37 : f32 to vector<8x128xf32>
      %82 = arith.subf %81, %33 : vector<8x128xf32>
      %83 = arith.mulf %82, %79 : vector<8x128xf32>
      %84 = arith.addf %80, %83 : vector<8x128xf32>
      %cst_38 = arith.constant 0.000000e+00 : f32
      %85 = vector.broadcast %cst_38 : f32 to vector<8x128xf32>
      %86 = arith.subf %85, %84 : vector<8x128xf32>
      %87 = arith.mulf %71, %86 : vector<8x128xf32>
      %cst_39 = arith.constant 0.000000e+00 : f32
      %88 = vector.broadcast %cst_39 : f32 to vector<8x128xf32>
      %89 = arith.select %25, %63, %88 : vector<8x128xi1>, vector<8x128xf32>
      %cst_40 = arith.constant 0.000000e+00 : f32
      %90 = vector.broadcast %cst_40 : f32 to vector<8x128xf32>
      %91 = arith.select %25, %87, %90 : vector<8x128xi1>, vector<8x128xf32>
      %cst_41 = arith.constant dense<0.000000e+00> : vector<128xf32>
      %92 = vector.multi_reduction <add>, %89, %cst_41 [0] : vector<8x128xf32> to vector<128xf32>
      %93 = vector.shape_cast %92 : vector<128xf32> to vector<1x128xf32>
      %cst_42 = arith.constant 0.000000e+00 : f32
      %94 = vector.shape_cast %93 : vector<1x128xf32> to vector<1x128xf32>
      %95 = vector.broadcast %94 : vector<1x128xf32> to vector<8x128xf32>
      %96 = vector.broadcast %cst_42 : f32 to vector<8x128xf32>
      %97 = arith.select %9, %95, %96 : vector<8x128xi1>, vector<8x128xf32>
      %98 = vector.shape_cast %97 : vector<8x128xf32> to vector<1x8x128xf32>
      %c0_43 = arith.constant 0 : index
      %c0_44 = arith.constant 0 : index
      %c0_45 = arith.constant 0 : index
      %99 = vector.load %arg8[%c0_43, %c0_44, %c0_45] : memref<1x8x128xf32, #tpu.memory_space<vmem>>, vector<1x8x128xf32>
      tpu.vector_store %arg8[%c0_43, %c0_44, %c0_45], %98 {strides = array<i32>} : memref<1x8x128xf32, #tpu.memory_space<vmem>>, vector<1x8x128xf32>,
      %cst_46 = arith.constant dense<0.000000e+00> : vector<128xf32>
      %100 = vector.multi_reduction <add>, %91, %cst_46 [0] : vector<8x128xf32> to vector<128xf32>
      %101 = vector.shape_cast %100 : vector<128xf32> to vector<1x128xf32>
      %cst_47 = arith.constant 0.000000e+00 : f32
      %102 = vector.shape_cast %101 : vector<1x128xf32> to vector<1x128xf32>
      %103 = vector.broadcast %102 : vector<1x128xf32> to vector<8x128xf32>
      %104 = vector.broadcast %cst_47 : f32 to vector<8x128xf32>
      %105 = arith.select %9, %103, %104 : vector<8x128xi1>, vector<8x128xf32>
      %106 = vector.shape_cast %105 : vector<8x128xf32> to vector<1x8x128xf32>
      %c0_48 = arith.constant 0 : index
      %c0_49 = arith.constant 0 : index
      %c0_50 = arith.constant 0 : index
      %107 = vector.load %arg9[%c0_48, %c0_49, %c0_50] : memref<1x8x128xf32, #tpu.memory_space<vmem>>, vector<1x8x128xf32>
      tpu.vector_store %arg9[%c0_48, %c0_49, %c0_50], %106 {strides = array<i32>} : memref<1x8x128xf32, #tpu.memory_space<vmem>>, vector<1x8x128xf32>,
      %cst_51 = arith.constant dense<0.000000e+00> : vector<128xf32>
      %108 = vector.multi_reduction <add>, %37, %cst_51 [0] : vector<8x128xf32> to vector<128xf32>
      %109 = vector.shape_cast %108 : vector<128xf32> to vector<1x128xf32>
      %cst_52 = arith.constant 0.000000e+00 : f32
      %110 = vector.shape_cast %109 : vector<1x128xf32> to vector<1x128xf32>
      %111 = vector.broadcast %110 : vector<1x128xf32> to vector<8x128xf32>
      %112 = vector.broadcast %cst_52 : f32 to vector<8x128xf32>
      %113 = arith.select %9, %111, %112 : vector<8x128xi1>, vector<8x128xf32>
      %114 = vector.shape_cast %113 : vector<8x128xf32> to vector<1x8x128xf32>
      %c0_53 = arith.constant 0 : index
      %c0_54 = arith.constant 0 : index
      %c0_55 = arith.constant 0 : index
      %115 = vector.load %arg10[%c0_53, %c0_54, %c0_55] : memref<1x8x128xf32, #tpu.memory_space<vmem>>, vector<1x8x128xf32>
      tpu.vector_store %arg10[%c0_53, %c0_54, %c0_55], %114 {strides = array<i32>} : memref<1x8x128xf32, #tpu.memory_space<vmem>>, vector<1x8x128xf32>,
    } else {
    }
    return
  }
  func.func @transform_0(%arg0: i32) -> (i32, i32) {
    %c0_i32 = arith.constant 0 : i32
    %c0_i32_0 = arith.constant 0 : i32
    return %arg0, %c0_i32 : i32, i32
  }
  func.func @transform_1(%arg0: i32) -> (i32, i32) {
    %c0_i32 = arith.constant 0 : i32
    %c0_i32_0 = arith.constant 0 : i32
    return %arg0, %c0_i32 : i32, i32
  }
  func.func @transform_2(%arg0: i32) -> (i32, i32) {
    %c0_i32 = arith.constant 0 : i32
    %c0_i32_0 = arith.constant 0 : i32
    return %arg0, %c0_i32 : i32, i32
  }
  func.func @transform_3(%arg0: i32) -> (i32, i32) {
    %c0_i32 = arith.constant 0 : i32
    %c0_i32_0 = arith.constant 0 : i32
    return %arg0, %c0_i32 : i32, i32
  }
  func.func @transform_4(%arg0: i32) -> (i32, i32) {
    %c0_i32 = arith.constant 0 : i32
    %c0_i32_0 = arith.constant 0 : i32
    return %arg0, %c0_i32 : i32, i32
  }
  func.func @transform_5(%arg0: i32) -> (i32, i32) {
    %c0_i32 = arith.constant 0 : i32
    %c0_i32_0 = arith.constant 0 : i32
    return %arg0, %c0_i32 : i32, i32
  }
  func.func @transform_6(%arg0: i32) -> (i32, i32) {
    %c0_i32 = arith.constant 0 : i32
    %c0_i32_0 = arith.constant 0 : i32
    return %arg0, %c0_i32 : i32, i32
  }
  func.func @transform_7(%arg0: i32) -> (i32, i32, i32) {
    %c0_i32 = arith.constant 0 : i32
    %c0_i32_0 = arith.constant 0 : i32
    %c0_i32_1 = arith.constant 0 : i32
    return %arg0, %c0_i32, %c0_i32_0 : i32, i32, i32
  }
  func.func @transform_8(%arg0: i32) -> (i32, i32, i32) {
    %c0_i32 = arith.constant 0 : i32
    %c0_i32_0 = arith.constant 0 : i32
    %c0_i32_1 = arith.constant 0 : i32
    return %arg0, %c0_i32, %c0_i32_0 : i32, i32, i32
  }
  func.func @transform_9(%arg0: i32) -> (i32, i32, i32) {
    %c0_i32 = arith.constant 0 : i32
    %c0_i32_0 = arith.constant 0 : i32
    %c0_i32_1 = arith.constant 0 : i32
    return %arg0, %c0_i32, %c0_i32_0 : i32, i32, i32
  }
}

</mosaic_0001>

<bundles_post_ra>
// kernel: tpu_custom_call.1
= control target key start
LH: loop header
LB: loop body
LE: loop exit
PB: predicated region body
PF: predicated region fallthrough
CT: control target
= control target key end

     0   :  { %15 = vsyncpa [#allocation3], 0  ;;  %s705_s0 = inlined_call_operand.hbm [shape: f32[8,128], index: 0, kind: input, shape index: {}]   ;;  %s706_s1 = inlined_call_operand.hbm [shape: f32[8,128], index: 1, kind: input, shape index: {}]   ;;  %s707_s2 = inlined_call_operand.hbm [shape: f32[8,128], index: 2, kind: input, shape index: {}]   ;;  %s708_s3 = inlined_call_operand.vmem [shape: f32[8,128], index: 3, kind: input, shape index: {}]   ;;  %s709_s4 = inlined_call_operand.hbm [shape: f32[8,128], index: 4, kind: input, shape index: {}]   ;;  %s710_s5 = inlined_call_operand.vmem [shape: f32[8,128], index: 5, kind: input, shape index: {}]   ;;  %s711_s6 = inlined_call_operand.hbm [shape: f32[8,128], index: 6, kind: input, shape index: {}]   ;;  %s712_s7 = inlined_call_operand.hbm [shape: f32[1,8,128], index: 7, kind: output, shape index: {0}]   ;;  %s713_s8 = inlined_call_operand.hbm [shape: f32[1,8,128], index: 8, kind: output, shape index: {1}]   ;;  %s714_s9 = inlined_call_operand.hbm [shape: f32[1,8,128], index: 9, kind: output, shape index: {2}]  }
   0x1   :  { %16 = vsyncpa [#allocation6], 0 }
   0x2   :  { %17 = vsyncpa [#allocation9], 0 }
   0x3   :  { %18 = vsyncpa [#allocation4], 0 }
   0x4   :  { %19 = vsyncpa [#allocation13], 0  ;;  %s501_s30 = smov [#allocation5]   ;;  %s502_s11 = smov [#allocation8]  }
   0x5   :  { %s36_s10 = sshll.u32 %s501_s30, 4  ;;  %s58_s12 = sshll.u32 %s502_s11, 4  ;;  %s37_s10 = int_to_ptr.vmem [resolvable:$true] %s36_s10  ;;  %s59_s12 = int_to_ptr.vmem [resolvable:$true] %s58_s12 }
   0x6   :  { %s315_s15 = scalar_lea.hbm %s706_s1, 128 }
   0x7   :  { %p316_p0 = scmp.ne.s32.totalorder %s706_s1, %s315_s15  ;;  %p319_p1 = scmp.lt.u32.totalorder %s315_s15, %s706_s1 }
   0x9   :  { %p321_p2 = pnand %p319_p1, %p316_p0 }
   0xb   :  { %324 = shalt.err (!%p321_p2)
}
   0xc   :  { %s325_s20 = scalar_lea.vmem %s37_s10, 128  ;;  %p330_p4 = scmp.lt.s32.totalorder %s37_s10, %s37_s10 }
   0xd   :  { %p326_p3 = scmp.ne.s32.totalorder %s37_s10, %s325_s20  ;;  %p331_p5 = scmp.lt.s32.totalorder %s325_s20, %s325_s20 }
   0xf   :  { %p332_p6 = por %p331_p5, %p330_p4 }
  0x11   :  { %p333_p7 = pnand %p332_p6, %p326_p3 }
  0x13   :  { %336 = shalt.err (!%p333_p7)
}
  0x14   :  { %39 = dma.hbm_to_vmem [thread:$0]  %s706_s1, 128, %s37_s10, [#allocation6]  }
  0x15   :  { %s337_s25 = scalar_lea.hbm %s709_s4, 128 }
  0x16   :  { %p338_p8 = scmp.ne.s32.totalorder %s709_s4, %s337_s25  ;;  %p341_p9 = scmp.lt.u32.totalorder %s337_s25, %s709_s4 }
  0x18   :  { %p343_p10 = pnand %p341_p9, %p338_p8 }
  0x1a   :  { %346 = shalt.err (!%p343_p10)
}
  0x1b   :  { %s347_s30 = scalar_lea.vmem %s59_s12, 128  ;;  %p352_p12 = scmp.lt.s32.totalorder %s59_s12, %s59_s12 }
  0x1c   :  { %p348_p11 = scmp.ne.s32.totalorder %s59_s12, %s347_s30  ;;  %p353_p13 = scmp.lt.s32.totalorder %s347_s30, %s347_s30 }
  0x1e   :  { %p354_p0 = por %p353_p13, %p352_p12 }
  0x20   :  { %p355_p1 = pnand %p354_p0, %p348_p11 }
  0x22   :  { %358 = shalt.err (!%p355_p1)
}
  0x23   :  { %61 = dma.hbm_to_vmem [thread:$0]  %s709_s4, 128, %s59_s12, [#allocation9]  }
  0x24   :  { %s503_s11 = smov [#allocation2]   ;;  %s504_s14 = smov [#allocation7]  }
  0x25   :  { %s26_s13 = sshll.u32 %s503_s11, 4  ;;  %s46_s15 = sshll.u32 %s504_s14, 4  ;;  %s27_s13 = int_to_ptr.vmem [resolvable:$true] %s26_s13  ;;  %s47_s15 = int_to_ptr.vmem [resolvable:$true] %s46_s15 }
  0x26   :  { %s359_s18 = scalar_lea.hbm %s705_s0, 128 }
  0x27   :  { %p360_p2 = scmp.ne.s32.totalorder %s705_s0, %s359_s18  ;;  %p363_p3 = scmp.lt.u32.totalorder %s359_s18, %s705_s0 }
  0x29   :  { %p365_p4 = pnand %p363_p3, %p360_p2 }
  0x2b   :  { %368 = shalt.err (!%p365_p4)
}
  0x2c   :  { %s369_s4 = scalar_lea.vmem %s27_s13, 128  ;;  %p374_p6 = scmp.lt.s32.totalorder %s27_s13, %s27_s13 }
  0x2d   :  { %p370_p5 = scmp.ne.s32.totalorder %s27_s13, %s369_s4  ;;  %p375_p7 = scmp.lt.s32.totalorder %s369_s4, %s369_s4 }
  0x2f   :  { %p376_p8 = por %p375_p7, %p374_p6 }
  0x31   :  { %p377_p9 = pnand %p376_p8, %p370_p5 }
  0x33   :  { %380 = shalt.err (!%p377_p9)
}
  0x34   :  { %29 = dma.hbm_to_vmem [thread:$0]  %s705_s0, 128, %s27_s13, [#allocation3]  }
  0x35   :  { %s381_s26 = scalar_lea.hbm %s707_s2, 128 }
  0x36   :  { %p382_p10 = scmp.ne.s32.totalorder %s707_s2, %s381_s26  ;;  %p385_p11 = scmp.lt.u32.totalorder %s381_s26, %s707_s2 }
  0x38   :  { %p387_p12 = pnand %p385_p11, %p382_p10 }
  0x3a   :  { %390 = shalt.err (!%p387_p12)
}
  0x3b   :  { %s391_s1 = scalar_lea.vmem %s47_s15, 128  ;;  %p396_p0 = scmp.lt.s32.totalorder %s47_s15, %s47_s15 }
  0x3c   :  { %p392_p13 = scmp.ne.s32.totalorder %s47_s15, %s391_s1  ;;  %p397_p1 = scmp.lt.s32.totalorder %s391_s1, %s391_s1 }
  0x3e   :  { %p398_p2 = por %p397_p1, %p396_p0 }
  0x40   :  { %p399_p3 = pnand %p398_p2, %p392_p13 }
  0x42   :  { %402 = shalt.err (!%p399_p3)
}
  0x43   :  { %49 = dma.hbm_to_vmem [thread:$0]  %s707_s2, 128, %s47_s15, [#allocation6]  }
  0x44   :  { %s505_s11 = smov [#allocation10]   ;;  %s403_s17 = scalar_lea.hbm %s711_s6, 128 }
  0x45   :  { %s70_s13 = sshll.u32 %s505_s11, 4  ;;  %p404_p4 = scmp.ne.s32.totalorder %s711_s6, %s403_s17  ;;  %s71_s13 = int_to_ptr.vmem [resolvable:$true] %s70_s13 }
  0x46   :  { %p407_p5 = scmp.lt.u32.totalorder %s403_s17, %s711_s6 }
  0x48   :  { %p409_p6 = pnand %p407_p5, %p404_p4 }
  0x4a   :  { %412 = shalt.err (!%p409_p6)
}
  0x4b   :  { %s413_s22 = scalar_lea.vmem %s71_s13, 128  ;;  %p418_p8 = scmp.lt.s32.totalorder %s71_s13, %s71_s13 }
  0x4c   :  { %p414_p7 = scmp.ne.s32.totalorder %s71_s13, %s413_s22  ;;  %p419_p9 = scmp.lt.s32.totalorder %s413_s22, %s413_s22 }
  0x4e   :  { %p420_p10 = por %p419_p9, %p418_p8 }
  0x50   :  { %p421_p11 = pnand %p420_p10, %p414_p7 }
  0x52   :  { %424 = shalt.err (!%p421_p11)
}
  0x53   :  { %73 = dma.hbm_to_vmem [thread:$0]  %s711_s6, 128, %s71_s13, [#allocation9]  }
  0x54   :  { %491 = dma.done.wait [#allocation3], 128  }
  0x55   :  { %492 = vsyncadd [#allocation3], 4294967168 }
  0x56   :  { %493 = dma.done.wait [#allocation6], 256  }
  0x57   :  { %494 = vsyncadd [#allocation6], 4294967040 }
  0x58   :  { %495 = dma.done.wait [#allocation9], 256  }
  0x59   :  { %496 = vsyncadd [#allocation9], 4294967040  ;;  %v96_v0 = vlaneseq  ;;  %v89_v5 = vld [vmem:[#allocation2] sm:$0xff]  ;;  %v93_v7 = vld [vmem:[#allocation8] sm:$0xff]  ;;  %s507_s24 = smov [#allocation14]   ;;  %s508_s26 = smov [#allocation11]  }
  0x5a   :  { %v92_v6 = vld [vmem:[%s708_s3] sm:$0xff]  ;;  %v91_v8 = vld [vmem:[#allocation7] sm:$0xff]  ;;  %v90_v36 = vld [vmem:[#allocation5] sm:$0xff]  ;;  %s275_s25 = sshll.u32 %s507_s24, 4  ;;  %s255_s27 = sshll.u32 %s508_s26, 4  ;;  %s660_s25 = int_to_ptr.vmem [resolvable:$true] %s275_s25  ;;  %s256_s27 = int_to_ptr.vmem [resolvable:$true] %s255_s27 }
  0x5b   :  { %v619_v1 = vshrl.u32 %v96_v0, 7  ;;  %v171_v2 = vand.u32 127, %v96_v0  ;;  %v95_v12 = vld [vmem:[#allocation10] sm:$0xff] }
  0x5c   :  { %v94_v24 = vld [vmem:[%s710_s5] sm:$0xff]  ;;  %s506_s5 = smov [#allocation12]  }
  0x5d   :  { %v173_v3 = vmul.u32 128, %v619_v1  ;;  %vm98_vm2 = vcmp.eq.s32.totalorder %v619_v1, 0  ;;  %s265_s23 = sshll.u32 %s506_s5, 4  ;;  %s266_s23 = int_to_ptr.vmem [resolvable:$true] %s265_s23 }
  0x5e   :  { %s425_s28 = scalar_lea.vmem %s266_s23, 128  ;;  %p430_p13 = scmp.lt.s32.totalorder %s266_s23, %s266_s23 }
  0x5f   :  { %v622_v4 = vadd.s32 %v173_v3, %v171_v2  ;;  %p426_p12 = scmp.ne.s32.totalorder %s266_s23, %s425_s28  ;;  %p431_p0 = scmp.lt.s32.totalorder %s425_s28, %s425_s28 }
  0x61   :  { %vm177_vm0 = vcmp.lt.s32.totalorder %v622_v4, 8  ;;  %p432_p1 = por %p431_p0, %p430_p13 }
  0x62   :  { %v178_v9 = vsel %vm177_vm0, %v89_v5, 0.5  ;;  %v180_v10 = vsel %vm177_vm0, %v93_v7, 0.5  ;;  %v634_v11 = vsel %vm177_vm0, %v92_v6, 0.0  ;;  %v179_v15 = vsel %vm177_vm0, %v91_v8, 1.0 }
  0x63   :  { %vm184_vm1 = vcmp.eq.f32.partialorder %v634_v11, 0.0  ;;  %v185_v13 = vsub.f32 1.0, %v178_v9  ;;  %301 = vlog2.f32 %v180_v10  ;;  %v213_v14 = vsub.f32 1.0, %v180_v10  ;;  %p433_p2 = pnand %p432_p1, %p426_p12 }
  0x64   :  { %v190_v16 = vadd.f32 1e-08, %v634_v11  ;;  %v183_v17 = vsel %vm177_vm0, %v95_v12, 0.0  ;;  %v198_v21 = vadd.f32 1e-08, %v179_v15  ;;  %v181_v27 = vsel %vm177_vm0, %v94_v24, 0.0 }
  0x65   :  { %v186_v18 = vsel %vm184_vm1, %v185_v13, %v178_v9  ;;  %303 = vlog2.f32 %v213_v14  ;;  %v241_v19 = vrot.slane %v183_v17, 4  ;;  %v218_v35 = vsub.f32 1.0, %v181_v27 }
  0x66   :  { %v187_v20 = vadd.f32 1e-08, %v186_v18  ;;  %305 = vlog2.f32 %v190_v16 }
  0x67   :  { %307 = vrcp.f32 %v179_v15  ;;  %v242_v22 = vadd.f32 %v241_v19, %v183_v17 }
  0x68   :  { %309 = vrcp.f32 %v187_v20 }
  0x69   :  { %v243_v23 = vrot.slane %v242_v22, 2  ;;  %311 = vlog2.f32 %v198_v21 }
  0x6a   :  { %313 = vlog2.f32 %v187_v20 }
  0x6b   :  { %v244_v25 = vadd.f32 %v243_v23, %v242_v22 }
  0x6d   :  { %v302_v26 = vpop.eup %301  ;;  %v245_v28 = vrot.slane %v244_v25, 1 }
  0x6e   :  { %v211_v29 = vmul.f32 0.6931472, %v302_v26 }
  0x6f   :  { %v304_v30 = vpop.eup %303  ;;  %v246_v31 = vadd.f32 %v245_v28, %v244_v25 }
  0x70   :  { %v306_v32 = vpop.eup %305  ;;  %v212_v33 = vmax.f32 %v211_v29, -100.0  ;;  %v215_v34 = vmul.f32 0.6931472, %v304_v30 }
  0x71   :  { %v308_v37 = vpop.eup %307  ;;  %v192_v38 = vmul.f32 0.6931472, %v306_v32  ;;  %v247_v39 = vsel %vm98_vm2, %v246_v31, 0.0 }
  0x72   :  { %v310_v40 = vpop.eup %309  ;;  %v216_v41 = vmax.f32 %v215_v34, -100.0  ;;  %v217_v42 = vmul.f32 %v212_v33, %v181_v27  ;;  %248 = vst [vmem:[#allocation14] sm:$0xff] %v247_v39 }
  0x73   :  { %v208_v43 = vmax.f32 %v310_v40, 0.1  ;;  %v193_v44 = vsub.f32 %v192_v38, %v90_v36  ;;  %v312_v45 = vpop.eup %311 }
  0x74   :  { %v219_v46 = vmul.f32 %v218_v35, %v216_v41  ;;  %v314_v47 = vpop.eup %313  ;;  %v200_v52 = vmul.f32 0.6931472, %v312_v45 }
  0x75   :  { %v195_v48 = vmul.f32 %v308_v37, %v193_v44  ;;  %v209_v49 = vmin.f32 %v208_v43, 10.0  ;;  %v189_v54 = vmul.f32 0.6931472, %v314_v47 }
  0x76   :  { %v220_v50 = vadd.f32 %v219_v46, %v217_v42 }
  0x77   :  { %v196_v51 = vmul.f32 -0.5, %v195_v48  ;;  %v202_v59 = vsub.f32 0.0, %v189_v54 }
  0x78   :  { %v221_v53 = vsub.f32 0.0, %v220_v50 }
  0x79   :  { %v197_v55 = vmul.f32 %v196_v51, %v195_v48 }
  0x7a   :  { %v222_v56 = vmul.f32 %v221_v53, %v209_v49 }
  0x7b   :  { %v201_v57 = vsub.f32 %v197_v55, %v200_v52 }
  0x7c   :  { %v224_v58 = vsel %vm177_vm0, %v222_v56, 0.0 }
  0x7d   :  { %v233_v60 = vrot.slane %v224_v58, 4  ;;  %v203_v61 = vsub.f32 %v201_v57, %v192_v38 }
  0x7f   :  { %v234_v62 = vadd.f32 %v233_v60, %v224_v58  ;;  %v204_v63 = vsel %vm184_vm1, 0.0, %v203_v61 }
  0x80   :  { %v205_v0 = vsub.f32 %v202_v59, %v204_v63 }
  0x81   :  { %v235_v2 = vrot.slane %v234_v62, 2 }
  0x82   :  { %v223_v3 = vsel %vm177_vm0, %v205_v0, 0.0 }
  0x83   :  { %v236_v5 = vadd.f32 %v235_v2, %v234_v62  ;;  %v225_v6 = vrot.slane %v223_v3, 4 }
  0x85   :  { %v237_v7 = vrot.slane %v236_v5, 1  ;;  %v226_v8 = vadd.f32 %v225_v6, %v223_v3 }
  0x87   :  { %v238_v9 = vadd.f32 %v237_v7, %v236_v5  ;;  %v227_v10 = vrot.slane %v226_v8, 2 }
  0x89   :  { %v239_v11 = vsel %vm98_vm2, %v238_v9, 0.0  ;;  %v228_v12 = vadd.f32 %v227_v10, %v226_v8 }
  0x8a   :  { %240 = vst [vmem:[#allocation12] sm:$0xff] %v239_v11 }
  0x8b   :  { %v229_v4 = vrot.slane %v228_v12, 1 }
  0x8c   :  { %436 = shalt.err (!%p433_p2)
}
  0x8d   :  { %s437_s1 = scalar_lea.hbm %s713_s8, 128 }
  0x8e   :  { %p438_p3 = scmp.ne.s32.totalorder %s713_s8, %s437_s1  ;;  %p441_p4 = scmp.lt.u32.totalorder %s437_s1, %s713_s8 }
  0x90   :  { %p443_p5 = pnand %p441_p4, %p438_p3 }
  0x92   :  { %446 = shalt.err (!%p443_p5)
}
  0x93   :  { %268 = dma.vmem_to_hbm [thread:$0]  %s266_s23, 128, %s713_s8, [#allocation13]  }
  0x94   :  { %s447_s17 = scalar_lea.vmem %s660_s25, 128  ;;  %p452_p7 = scmp.lt.s32.totalorder %s660_s25, %s660_s25 }
  0x95   :  { %p448_p6 = scmp.ne.s32.totalorder %s660_s25, %s447_s17  ;;  %p453_p8 = scmp.lt.s32.totalorder %s447_s17, %s447_s17 }
  0x97   :  { %p454_p9 = por %p453_p8, %p452_p7 }
  0x99   :  { %p455_p10 = pnand %p454_p9, %p448_p6 }
  0x9b   :  { %458 = shalt.err (!%p455_p10)
}
  0x9c   :  { %s459_s20 = scalar_lea.hbm %s714_s9, 128 }
  0x9d   :  { %p460_p11 = scmp.ne.s32.totalorder %s714_s9, %s459_s20  ;;  %p463_p12 = scmp.lt.u32.totalorder %s459_s20, %s714_s9 }
  0x9f   :  { %p465_p13 = pnand %p463_p12, %p460_p11 }
  0xa1   :  { %468 = shalt.err (!%p465_p13)
}
  0xa2   :  { %278 = dma.vmem_to_hbm [thread:$0]  %s660_s25, 128, %s714_s9, [#allocation13]   ;;  %v230_v13 = vadd.f32 %v229_v4, %v228_v12 }
  0xa3   :  { %s469_s12 = scalar_lea.vmem %s256_s27, 128  ;;  %p474_p1 = scmp.lt.s32.totalorder %s256_s27, %s256_s27 }
  0xa4   :  { %v231_v14 = vsel %vm98_vm2, %v230_v13, 0.0  ;;  %p470_p0 = scmp.ne.s32.totalorder %s256_s27, %s469_s12  ;;  %p475_p2 = scmp.lt.s32.totalorder %s469_s12, %s469_s12 }
  0xa5   :  { %232 = vst [vmem:[#allocation11] sm:$0xff] %v231_v14 }
  0xa6   :  { %p476_p3 = por %p475_p2, %p474_p1 }
  0xa8   :  { %p477_p4 = pnand %p476_p3, %p470_p0 }
  0xaa   :  { %480 = shalt.err (!%p477_p4)
}
  0xab   :  { %s481_s5 = scalar_lea.hbm %s712_s7, 128 }
  0xac   :  { %p482_p5 = scmp.ne.s32.totalorder %s712_s7, %s481_s5  ;;  %p485_p6 = scmp.lt.u32.totalorder %s481_s5, %s712_s7 }
  0xae   :  { %p487_p7 = pnand %p485_p6, %p482_p5 }
  0xb0   :  { %490 = shalt.err (!%p487_p7)
}
  0xb1   :  { %258 = dma.vmem_to_hbm [thread:$0]  %s256_s27, 128, %s712_s7, [#allocation4]  }
  0xb2   :  { %497 = dma.done.wait [#allocation4], 128  }
  0xb3   :  { %498 = vsyncadd [#allocation4], 4294967168 }
  0xb4   :  { %499 = dma.done.wait [#allocation13], 256  }
  0xb5   :  { %500 = vsyncadd [#allocation13], 4294967040 }
  0xb6   :  { %288 = vsyncpa [#allocation3], 1 }
  0xb7   :  { %289 = vsyncpa [#allocation6], 1 }
  0xb8   :  { %290 = vsyncpa [#allocation9], 1 }
  0xb9   :  { %291 = vsyncpa [#allocation4], 1 }
  0xba   :  { %292 = vsyncpa [#allocation13], 1 }

</bundles_post_ra>
